<compile_context>
chip_gen: v7x
topology: tpu7x:2x2x1
jax: 0.10.0
libtpu: 0.0.40
codegen_flags: <defaults>
</compile_context>

<pallas_src>
import functools

import jax
import jax.numpy as jnp
from jax import lax
from jax.experimental import pallas as pl
from jax.experimental.pallas import tpu as pltpu


# -----------------------------------------------------------------------------
# pltpu.roll shift-sign probe (run once, outside jit): pins the roll convention
# against jnp.roll so the conv tap shifts are provably in the right direction.
# -----------------------------------------------------------------------------

_ROLL_MATCHES_JNP = None


def _roll_matches_jnp():
    global _ROLL_MATCHES_JNP
    if _ROLL_MATCHES_JNP is None:
        def k(x_ref, o_ref):
            o_ref[...] = pltpu.roll(x_ref[...], shift=1, axis=1)

        with jax.ensure_compile_time_eval():
            x = jnp.arange(8 * 128, dtype=jnp.float32).reshape(8, 128)
            y = pl.pallas_call(
                k, out_shape=jax.ShapeDtypeStruct((8, 128), jnp.float32))(x)
            _ROLL_MATCHES_JNP = bool(jnp.all(y == jnp.roll(x, 1, axis=1)))
    return _ROLL_MATCHES_JNP


# -----------------------------------------------------------------------------
# in-kernel helpers
# -----------------------------------------------------------------------------

def _conv27_accumulate(x, w_ref, shifts):
    # x: (Cin, L) bf16; w_ref: (27, Cout, Cin) bf16 -> (Cout, L) f32.
    # out[:, p] = sum_t w[t] @ x[:, p + off_t]  — 27-tap shift-and-accumulate.
    # Roll wrap-around only contaminates padded-border / lane-tail positions,
    # which the interior mask and the final interior slice discard.
    acc = None
    for t, sh in enumerate(shifts):
        xs = x if sh == 0 else pltpu.roll(x, shift=sh, axis=1)
        term = jnp.dot(w_ref[t], xs, preferred_element_type=jnp.float32)
        acc = term if acc is None else acc + term
    return acc


def _groupnorm(acc, gamma, beta, m, groups, eps, inv_count):
    # acc: (Cout, L) f32; gamma/beta: (Cout, 1) f32; m: (1, L) interior mask.
    # Per-channel masked sums reduced to per-group stats via tiny constant
    # indicator matmuls (no awkward in-kernel reshapes of the big tile).
    cout = acc.shape[0]
    cg = cout // groups
    xm = acc * m
    ch_sum = jnp.sum(xm, axis=1, keepdims=True)                      # (Cout, 1)
    if cg == 1:                                                      # group == channel
        mean_c = ch_sum * inv_count
    else:
        ind_gc = (lax.broadcasted_iota(jnp.int32, (groups, cout), 1) // cg
                  == lax.broadcasted_iota(jnp.int32, (groups, cout), 0)
                  ).astype(jnp.float32)                              # (G, Cout)
        ind_cg = (lax.broadcasted_iota(jnp.int32, (cout, groups), 0) // cg
                  == lax.broadcasted_iota(jnp.int32, (cout, groups), 1)
                  ).astype(jnp.float32)                              # (Cout, G)
        mean_c = jnp.dot(
            ind_cg, jnp.dot(ind_gc, ch_sum, preferred_element_type=jnp.float32),
            preferred_element_type=jnp.float32) * inv_count
    d = (acc - mean_c) * m                                           # masked centered
    ss = jnp.sum(d * d, axis=1, keepdims=True)                       # (Cout, 1)
    if cg == 1:
        var_c = ss * inv_count
    else:
        var_c = jnp.dot(
            ind_cg, jnp.dot(ind_gc, ss, preferred_element_type=jnp.float32),
            preferred_element_type=jnp.float32) * inv_count
    return d * lax.rsqrt(var_c + eps) * gamma + beta


def _elu(y):
    return jnp.where(y > 0.0, y, jnp.expm1(y))


# -----------------------------------------------------------------------------
# Pallas kernels
# -----------------------------------------------------------------------------

def _conv1x1_kernel(x_ref, w_ref, b_ref, m_ref, o_ref):
    # x: (1, Cin, L) bf16, w: (Cout, Cin) bf16, b: (Cout, 1) f32, m: (1, L) f32
    y = jnp.dot(w_ref[...], x_ref[0], preferred_element_type=jnp.float32)
    o_ref[0] = ((y + b_ref[...]) * m_ref[...]).astype(o_ref.dtype)


def _conv3_gn_elu_kernel(x_ref, w_ref, g_ref, b_ref, m_ref, o_ref, *,
                         shifts, groups, eps, inv_count):
    # fused: 3x3x3 conv -> GroupNorm -> ELU -> re-mask (ready for next conv)
    m = m_ref[...]
    acc = _conv27_accumulate(x_ref[0], w_ref, shifts)
    y = _groupnorm(acc, g_ref[...], b_ref[...], m, groups, eps, inv_count)
    o_ref[0] = (_elu(y) * m).astype(o_ref.dtype)


def _conv3_gn_res_elu_kernel(x_ref, r_ref, w_ref, g_ref, b_ref, m_ref, o_ref, *,
                             shifts, groups, eps, inv_count):
    # fused: 3x3x3 conv -> GroupNorm -> +residual -> ELU -> re-mask
    m = m_ref[...]
    acc = _conv27_accumulate(x_ref[0], w_ref, shifts)
    y = _groupnorm(acc, g_ref[...], b_ref[...], m, groups, eps, inv_count)
    y = y + r_ref[0].astype(jnp.float32)
    o_ref[0] = (_elu(y) * m).astype(o_ref.dtype)


# -----------------------------------------------------------------------------
# pallas_call wrappers
# -----------------------------------------------------------------------------

def _pallas_conv1x1(x, w, b, mask):
    N, Cin, L = x.shape
    Cout = w.shape[0]
    return pl.pallas_call(
        _conv1x1_kernel,
        out_shape=jax.ShapeDtypeStruct((N, Cout, L), jnp.bfloat16),
        grid=(N,),
        in_specs=[pl.BlockSpec((1, Cin, L), lambda n: (n, 0, 0)),
                  pl.BlockSpec((Cout, Cin), lambda n: (0, 0)),
                  pl.BlockSpec((Cout, 1), lambda n: (0, 0)),
                  pl.BlockSpec((1, L), lambda n: (0, 0))],
        out_specs=pl.BlockSpec((1, Cout, L), lambda n: (n, 0, 0)),
        compiler_params=pltpu.CompilerParams(
            dimension_semantics=("parallel",)),
    )(x, w, b, mask)


def _pallas_conv3_gn_elu(x, w_taps, gamma, beta, mask, shifts, groups,
                         interior_size, eps, out_dtype, residual=None):
    N, Cin, L = x.shape
    Cout = w_taps.shape[1]
    assert Cout % groups == 0
    inv_count = 1.0 / float((Cout // groups) * interior_size)
    gc = gamma.astype(jnp.float32).reshape(Cout, 1)
    bc = beta.astype(jnp.float32).reshape(Cout, 1)

    x_spec = pl.BlockSpec((1, Cin, L), lambda n: (n, 0, 0))
    r_spec = pl.BlockSpec((1, Cout, L), lambda n: (n, 0, 0))
    w_spec = pl.BlockSpec((27, Cout, Cin), lambda n: (0, 0, 0))
    p_spec = pl.BlockSpec((Cout, 1), lambda n: (0, 0))
    m_spec = pl.BlockSpec((1, L), lambda n: (0, 0))
    o_spec = pl.BlockSpec((1, Cout, L), lambda n: (n, 0, 0))

    if residual is None:
        kernel = functools.partial(_conv3_gn_elu_kernel, shifts=shifts,
                                   groups=groups, eps=eps, inv_count=inv_count)
        in_specs = [x_spec, w_spec, p_spec, p_spec, m_spec]
        args = (x, w_taps, gc, bc, mask)
    else:
        kernel = functools.partial(_conv3_gn_res_elu_kernel, shifts=shifts,
                                   groups=groups, eps=eps, inv_count=inv_count)
        in_specs = [x_spec, r_spec, w_spec, p_spec, p_spec, m_spec]
        args = (x, residual, w_taps, gc, bc, mask)

    return pl.pallas_call(
        kernel,
        out_shape=jax.ShapeDtypeStruct((N, Cout, L), out_dtype),
        grid=(N,),
        in_specs=in_specs,
        out_specs=o_spec,
        compiler_params=pltpu.CompilerParams(
            dimension_semantics=("parallel",)),
    )(*args)


# -----------------------------------------------------------------------------
# ResNetBlock forward
# -----------------------------------------------------------------------------

def resnet_block_forward(x, params, num_groups=8, eps=1e-5):
    """x: (N, Cin, D, H, W) float32 — same NCDHW layout as PyTorch Conv3d."""
    N, Cin, D, H, W = x.shape
    Cout = params["w1"].shape[0]
    G = num_groups if Cout >= num_groups else 1   # mirrors create_conv fallback
    assert Cout % G == 0

    Dp, Hp, Wp = D + 2, H + 2, W + 2
    Sp = Dp * Hp * Wp
    L = ((Sp + 127) // 128) * 128        # lane-pad the flat spatial axis
    S = D * H * W

    # interior mask over the padded-flat axis (0 on zero-pad borders and tail)
    ind = jnp.arange(Dp).reshape(Dp, 1, 1)
    inh = jnp.arange(Hp).reshape(1, Hp, 1)
    inw = jnp.arange(Wp).reshape(1, 1, Wp)
    interior = ((ind >= 1) & (ind <= D) & (inh >= 1) & (inh <= H)
                & (inw >= 1) & (inw <= W))
    mask = jnp.pad(interior.reshape(1, Sp).astype(jnp.float32),
                   ((0, 0), (0, L - Sp)))

    # zero-pad spatially once, flatten, lane-pad, bf16 for the MXU
    xp = jnp.pad(x, ((0, 0), (0, 0), (1, 1), (1, 1), (1, 1)))
    xp = jnp.pad(xp.reshape(N, Cin, Sp), ((0, 0), (0, 0), (0, L - Sp)))
    xp = xp.astype(jnp.bfloat16)

    # per-tap shift amounts along the padded-flat axis (static Python ints)
    sign = -1 if _roll_matches_jnp() else 1
    shifts = tuple(
        (sign * ((kd - 1) * Hp * Wp + (kh - 1) * Wp + (kw - 1))) % L
        for kd in range(3) for kh in range(3) for kw in range(3))

    def tap_weights(w):                  # (Cout, Ci, 3,3,3) -> (27, Cout, Ci)
        co, ci = w.shape[0], w.shape[1]
        return jnp.transpose(w.reshape(co, ci, 27), (2, 0, 1)).astype(jnp.bfloat16)

    # conv1 (1x1x1, bias) -> residual in padded-flat layout (borders zeroed)
    w1 = params["w1"].reshape(Cout, Cin).astype(jnp.bfloat16)
    b1 = params["b1"].reshape(Cout, 1).astype(jnp.float32)
    res_p = _pallas_conv1x1(xp, w1, b1, mask)                # (N, Cout, L) bf16

    # conv2 -> GroupNorm -> ELU   (single fused kernel, bf16 to HBM)
    y2 = _pallas_conv3_gn_elu(res_p, tap_weights(params["w2"]),
                              params["g2"], params["bt2"], mask, shifts, G, S,
                              eps, out_dtype=jnp.bfloat16)

    # conv3 -> GroupNorm -> (+ residual) -> ELU   (single fused kernel, f32 out)
    outp = _pallas_conv3_gn_elu(y2, tap_weights(params["w3"]),
                                params["g3"], params["bt3"], mask, shifts, G, S,
                                eps, out_dtype=jnp.float32, residual=res_p)

    # drop all padding: (N, Cout, L) -> (N, Cout, D, H, W)
    out = outp[:, :, :Sp].reshape(N, Cout, Dp, Hp, Wp)[:, :, 1:-1, 1:-1, 1:-1]
    return out


# -----------------------------------------------------------------------------
# pure-JAX reference (PyTorch semantics, f32)
# -----------------------------------------------------------------------------

def ref_forward(x, params, num_groups=8, eps=1e-5):
    def conv3d(x, w, b=None, pad=0):
        dn = lax.conv_dimension_numbers(x.shape, w.shape,
                                        ("NCDHW", "OIDHW", "NCDHW"))
        y = lax.conv_general_dilated(x, w, (1, 1, 1), [(pad, pad)] * 3,
                                     dimension_numbers=dn)
        if b is not None:
            y = y + b.reshape(1, -1, 1, 1, 1)
        return y

    def gn(x, gamma, beta):
        N, C, D, H, W = x.shape
        xg = x.reshape(N, num_groups, -1)
        m = xg.mean(-1, keepdims=True)
        v = ((xg - m) ** 2).mean(-1, keepdims=True)
        xn = ((xg - m) / jnp.sqrt(v + eps)).reshape(N, C, D, H, W)
        return xn * gamma.reshape(1, -1, 1, 1, 1) + beta.reshape(1, -1, 1, 1, 1)

    def elu(v):
        return jnp.where(v > 0, v, jnp.expm1(v))

    residual = conv3d(x, params["w1"], params["b1"], pad=0)
    out = elu(gn(conv3d(residual, params["w2"], pad=1),
                 params["g2"], params["bt2"]))
    out = gn(conv3d(out, params["w3"], pad=1), params["g3"], params["bt3"])
    return elu(out + residual)


# -----------------------------------------------------------------------------
# main
# -----------------------------------------------------------------------------

if __name__ == "__main__":
    key = jax.random.PRNGKey(0)
    ks = jax.random.split(key, 5)
    N, Cin, Cout, D, H, W = 2, 4, 8, 8, 8, 8

    x = jax.random.normal(ks[0], (N, Cin, D, H, W), jnp.float32)
    params = dict(
        # conv1 (1x1x1, bias=True) — PyTorch weight layout (Cout, Cin, 1,1,1)
        w1=0.2 * jax.random.normal(ks[1], (Cout, Cin, 1, 1, 1), jnp.float32),
        b1=0.1 * jax.random.normal(ks[2], (Cout,), jnp.float32),
        # conv2 / conv3 (3x3x3, bias=False) — (Cout, Cout, 3, 3, 3)
        w2=0.1 * jax.random.normal(ks[3], (Cout, Cout, 3, 3, 3), jnp.float32),
        w3=0.1 * jax.random.normal(ks[4], (Cout, Cout, 3, 3, 3), jnp.float32),
        # GroupNorm affine params at PyTorch defaults (ones / zeros)
        g2=jnp.ones((Cout,), jnp.float32), bt2=jnp.zeros((Cout,), jnp.float32),
        g3=jnp.ones((Cout,), jnp.float32), bt3=jnp.zeros((Cout,), jnp.float32),
    )

    _roll_matches_jnp()   # resolve the roll convention outside jit tracing

    out = jax.jit(resnet_block_forward)(x, params)
    out = jax.block_until_ready(out)
    assert out.shape == (N, Cout, D, H, W)

    ref = ref_forward(x, params)
    max_err = float(jnp.max(jnp.abs(out - ref)))
    # bf16 MXU inputs / bf16 inter-stage activations => relaxed tolerance
    if not (max_err < 1e-1):
        raise AssertionError(f"Pallas output mismatch vs reference: {max_err}")

    print("KERNEL_OK")
</pallas_src>

<mosaic_0001>
module attributes {stable_mosaic.version = 11 : i64} {
  func.func @k(%arg0: memref<8x128xf32, #tpu.memory_space<vmem>>, %arg1: memref<8x128xf32, #tpu.memory_space<vmem>>) attributes {dimension_semantics = [], scalar_prefetch = 0 : i64, scratch_operands = 0 : i64, tpu.core_type = #tpu.core_type<tc>} {
    %c0 = arith.constant 0 : index
    %c0_0 = arith.constant 0 : index
    %0 = vector.load %arg0[%c0, %c0_0] : memref<8x128xf32, #tpu.memory_space<vmem>>, vector<8x128xf32>
    %c1_i32 = arith.constant 1 : i32
    %1 = tpu.dynamic_rotate %0 by %c1_i32 dim 1 : vector<8x128xf32>, i32 -> vector<8x128xf32>
    %c0_1 = arith.constant 0 : index
    %c0_2 = arith.constant 0 : index
    %2 = vector.load %arg1[%c0_1, %c0_2] : memref<8x128xf32, #tpu.memory_space<vmem>>, vector<8x128xf32>
    tpu.vector_store %arg1[%c0_1, %c0_2], %1 {strides = array<i32>} : memref<8x128xf32, #tpu.memory_space<vmem>>, vector<8x128xf32>,
    return
  }
}

</mosaic_0001>

<bundles_post_ra>
// kernel: tpu_custom_call.1
= control target key start
LH: loop header
LB: loop body
LE: loop exit
PB: predicated region body
PF: predicated region fallthrough
CT: control target
= control target key end

     0   :  { %6 = vsyncpa [#allocation3], 0  ;;  %s128_s0 = inlined_call_operand.hbm [shape: f32[8,128], index: 0, kind: input, shape index: {}]   ;;  %s129_s1 = inlined_call_operand.hbm [shape: f32[8,128], index: 1, kind: output, shape index: {}]  }
   0x1   :  { %7 = vsyncpa [#allocation4], 0  ;;  %s91_s6 = smov [#allocation2]   ;;  %s43_s10 = scalar_lea.hbm %s128_s0, 128 }
   0x2   :  { %s14_s7 = sshll.u32 %s91_s6, 4  ;;  %p44_p0 = scmp.ne.s32.totalorder %s128_s0, %s43_s10  ;;  %s15_s7 = int_to_ptr.vmem [resolvable:$true] %s14_s7 }
   0x3   :  { %p47_p1 = scmp.lt.u32.totalorder %s43_s10, %s128_s0 }
   0x5   :  { %p49_p2 = pnand %p47_p1, %p44_p0 }
   0x7   :  { %52 = shalt.err (!%p49_p2)
}
   0x8   :  { %s53_s15 = scalar_lea.vmem %s15_s7, 128  ;;  %p58_p4 = scmp.lt.s32.totalorder %s15_s7, %s15_s7 }
   0x9   :  { %p54_p3 = scmp.ne.s32.totalorder %s15_s7, %s53_s15  ;;  %p59_p5 = scmp.lt.s32.totalorder %s53_s15, %s53_s15 }
   0xb   :  { %p60_p6 = por %p59_p5, %p58_p4 }
   0xd   :  { %p61_p7 = pnand %p60_p6, %p54_p3 }
   0xf   :  { %64 = shalt.err (!%p61_p7)
}
  0x10   :  { %17 = dma.hbm_to_vmem [thread:$0]  %s128_s0, 128, %s15_s7, [#allocation3]  }
  0x11   :  { %87 = dma.done.wait [#allocation3], 128  }
  0x12   :  { %88 = vsyncadd [#allocation3], 4294967168  ;;  %v21_v0 = vld [vmem:[#allocation2] sm:$0xff]  ;;  %s92_s18 = smov 1   ;;  %s93_s19 = smov [#allocation5]  }
  0x13   :  { %22 = vrot.lane.b32.xlu0 %v21_v0, %s92_s18  ;;  %s31_s20 = sshll.u32 %s93_s19, 4  ;;  %s32_s20 = int_to_ptr.vmem [resolvable:$true] %s31_s20 }
  0x14   :  { %s65_s21 = scalar_lea.vmem %s32_s20, 128  ;;  %p70_p9 = scmp.lt.s32.totalorder %s32_s20, %s32_s20 }
  0x15   :  { %p66_p8 = scmp.ne.s32.totalorder %s32_s20, %s65_s21  ;;  %p71_p10 = scmp.lt.s32.totalorder %s65_s21, %s65_s21 }
  0x17   :  { %p72_p11 = por %p71_p10, %p70_p9 }
  0x19   :  { %p73_p12 = pnand %p72_p11, %p66_p8 }
  0x85   :  { %v23_v1 = vpop.permute.xlu0 %22 }
  0x86   :  { %24 = vst [vmem:[#allocation5] sm:$0xff] %v23_v1 }
  0x87   :  { %76 = shalt.err (!%p73_p12)
}
  0x88   :  { %s77_s0 = scalar_lea.hbm %s129_s1, 128 }
  0x89   :  { %p78_p13 = scmp.ne.s32.totalorder %s129_s1, %s77_s0  ;;  %p81_p0 = scmp.lt.u32.totalorder %s77_s0, %s129_s1 }
  0x8b   :  { %p83_p1 = pnand %p81_p0, %p78_p13 }
  0x8d   :  { %86 = shalt.err (!%p83_p1)
}
  0x8e   :  { %34 = dma.vmem_to_hbm [thread:$0]  %s32_s20, 128, %s129_s1, [#allocation4]  }
  0x8f   :  { %89 = dma.done.wait [#allocation4], 128  }
  0x90   :  { %90 = vsyncadd [#allocation4], 4294967168 }
  0x91   :  { %38 = vsyncpa [#allocation3], 1 }
  0x92   :  { %39 = vsyncpa [#allocation4], 1 }

</bundles_post_ra>
